<compile_context>
chip_gen: v7x
topology: tpu7x:2x2x1
jax: 0.10.0
libtpu: 0.0.40
codegen_flags: <defaults>
</compile_context>

<pallas_src>
import functools

import jax
import jax.numpy as jnp
from jax.experimental import pallas as pl
from jax.experimental.pallas import tpu as pltpu

EPS = 1e-5
_TARGET_BLOCK_BYTES = 4 * 1024 * 1024     # ~4 MiB tiles (review: 4-8 MiB sweet spot)
_VMEM_LIMIT_BYTES = 32 * 1024 * 1024      # explicit scoped VMEM (v5e default is 16 MiB)
_FAST_PATH_BYTES = 4 * 1024 * 1024        # whole-tensor-in-VMEM fused-path threshold


# ---------------------------------------------------------------------------
# Fast path: whole tensor resident in VMEM, single kernel, 1 read + 1 write.
# ---------------------------------------------------------------------------
def _fused_bn_kernel(x_ref, g_ref, b_ref, o_ref, *, inv_count):
    x = x_ref[...].astype(jnp.float32)                          # (N, C, HW)
    mean = jnp.sum(x, axis=(0, 2), keepdims=True) * inv_count   # (1, C, 1)
    centered = x - mean                                         # exact two-pass var
    var = jnp.sum(centered * centered, axis=(0, 2), keepdims=True) * inv_count
    inv_std = jax.lax.rsqrt(var + EPS)
    g = g_ref[...].astype(jnp.float32)[None]                    # (1, C, 1)
    b = b_ref[...].astype(jnp.float32)[None]
    o_ref[...] = (centered * (inv_std * g) + b).astype(o_ref.dtype)


# ---------------------------------------------------------------------------
# General path, pass 1: per-sample partial sums (N axis stays "parallel").
# ---------------------------------------------------------------------------
def _stats_kernel(x_ref, sum_ref, sq_ref):
    t = pl.program_id(1)

    @pl.when(t == 0)
    def _init():
        sum_ref[...] = jnp.zeros_like(sum_ref)
        sq_ref[...] = jnp.zeros_like(sq_ref)

    x = x_ref[0].astype(jnp.float32)                            # (C, hw_tile)
    # TODO(synk): if pass 1 ever becomes XLU-bound (e.g. bf16 inputs on v5e),
    # route these reductions through the idle MXU via jnp.dot(x, ones((hw,1))).
    sum_ref[...] += jnp.sum(x, axis=-1, keepdims=True)[None]    # (1, C, 1)
    sq_ref[...] += jnp.sum(x * x, axis=-1, keepdims=True)[None]


# ---------------------------------------------------------------------------
# General path, pass 2: lane-dense normalize, y = x*scale + shift.
# ---------------------------------------------------------------------------
def _norm_nchw_kernel(x_ref, scale_ref, shift_ref, o_ref):
    scale = scale_ref[...][None]                                # (1, C, 1)
    shift = shift_ref[...][None]
    o_ref[...] = (x_ref[...].astype(jnp.float32) * scale + shift).astype(o_ref.dtype)


def _norm_flat_kernel(x_ref, scale_ref, shift_ref, o_ref):
    o_ref[...] = (x_ref[...].astype(jnp.float32) * scale_ref[...]
                  + shift_ref[...]).astype(o_ref.dtype)


# ---------------------------------------------------------------------------
# Tile pickers.
# ---------------------------------------------------------------------------
def _pick_hw_tile(C, HW, itemsize, target_bytes=_TARGET_BLOCK_BYTES):
    """Largest 128-multiple divisor of HW whose (1, C, tile) block ~<= target."""
    if HW % 128 != 0:
        return HW                                  # full lane extent (== array dim)
    row_bytes = max(C * itemsize, 1)
    target_tile = max(128, (target_bytes // row_bytes) // 128 * 128)
    if HW <= target_tile:
        return HW
    tile = target_tile
    while tile >= 128 and HW % tile != 0:
        tile -= 128
    tile = max(tile, 128)
    # Tiny-tile cliff guard: if only a small divisor exists, prefer full rows
    # when they still fit comfortably.
    if tile * row_bytes < 512 * 1024 and HW * row_bytes <= 2 * target_bytes:
        return HW
    return tile


def _pick_w_tile(N, CW, itemsize, target_bytes=_TARGET_BLOCK_BYTES):
    """128-multiple divisor of CW for (N, w_tile) blocks; None -> unusable."""
    if CW % 128 != 0:
        return None
    col_bytes = max(N * itemsize, 1)
    target_tile = (target_bytes // col_bytes) // 128 * 128
    if target_tile < 128:
        return None                                # N too large for this layout
    if CW <= target_tile:
        return CW
    tile = target_tile
    while tile >= 128 and CW % tile != 0:
        tile -= 128
    tile = max(tile, 128)
    if tile * col_bytes < 512 * 1024:
        return None                                # would hit the tiny-tile cliff
    return tile


# ---------------------------------------------------------------------------
# Wrapper.
# ---------------------------------------------------------------------------
@functools.partial(jax.jit, static_argnames=("cls_ind",))
def bn_mux_forward(x_nchw, gammas, betas, cls_ind=0):
    """Applies the cls_ind-th BatchNorm2d (batch-statistics mode) to x_nchw.

    x_nchw : (N, C, H, W)
    gammas : (num_domains, C)   per-domain BN weight
    betas  : (num_domains, C)   per-domain BN bias
    """
    N, C, H, W = x_nchw.shape
    HW = H * W
    L = N * HW
    itemsize = x_nchw.dtype.itemsize

    # BN multiplexing == static parameter selection (self.bn[cfg.cls_ind]).
    gamma = gammas[cls_ind].reshape(C, 1).astype(jnp.float32)
    beta = betas[cls_ind].reshape(C, 1).astype(jnp.float32)

    # Free contiguous reshape, no HBM transpose: C on sublanes, H*W on lanes.
    x3 = x_nchw.reshape(N, C, HW)

    # -------- Fast path: whole tensor fits comfortably in VMEM --------------
    if N * C * HW * itemsize <= _FAST_PATH_BYTES:
        out3 = pl.pallas_call(
            functools.partial(_fused_bn_kernel, inv_count=1.0 / L),
            out_shape=jax.ShapeDtypeStruct((N, C, HW), x_nchw.dtype),
            compiler_params=pltpu.CompilerParams(
                vmem_limit_bytes=_VMEM_LIMIT_BYTES),
        )(x3, gamma, beta)
        return out3.reshape(N, C, H, W)

    # -------- Pass 1: per-channel batch statistics ---------------------------
    hw_tile = _pick_hw_tile(C, HW, itemsize)
    n_hw = HW // hw_tile

    part_sum, part_sq = pl.pallas_call(
        _stats_kernel,
        grid=(N, n_hw),
        in_specs=[pl.BlockSpec((1, C, hw_tile), lambda n, t: (n, 0, t))],
        out_specs=[
            pl.BlockSpec((1, C, 1), lambda n, t: (n, 0, 0)),
            pl.BlockSpec((1, C, 1), lambda n, t: (n, 0, 0)),
        ],
        out_shape=[
            jax.ShapeDtypeStruct((N, C, 1), jnp.float32),
            jax.ShapeDtypeStruct((N, C, 1), jnp.float32),
        ],
        compiler_params=pltpu.CompilerParams(
            dimension_semantics=("parallel", "arbitrary"),
            vmem_limit_bytes=_VMEM_LIMIT_BYTES,
        ),
    )(x3)

    # O(C) finalize in plain JAX (keeps pass 1 megacore-parallel on v7x).
    # TODO(synk): E[x^2]-mean^2 can cancel when |mean| >> std per channel;
    # switch to a Welford merge of per-sample (mean, M2) partials if needed.
    inv_count = 1.0 / L
    mean = jnp.sum(part_sum, axis=0) * inv_count                   # (C, 1)
    var = jnp.maximum(jnp.sum(part_sq, axis=0) * inv_count - mean * mean, 0.0)
    inv_std = jax.lax.rsqrt(var + EPS)
    scale = gamma * inv_std                                        # (C, 1)
    shift = beta - mean * scale

    # -------- Pass 2: lane-dense, fully parallel normalize -------------------
    if HW % 128 == 0:
        out3 = pl.pallas_call(
            _norm_nchw_kernel,
            grid=(N, n_hw),
            in_specs=[
                pl.BlockSpec((1, C, hw_tile), lambda n, t: (n, 0, t)),
                pl.BlockSpec((C, 1), lambda n, t: (0, 0)),
                pl.BlockSpec((C, 1), lambda n, t: (0, 0)),
            ],
            out_specs=pl.BlockSpec((1, C, hw_tile), lambda n, t: (n, 0, t)),
            out_shape=jax.ShapeDtypeStruct((N, C, HW), x_nchw.dtype),
            compiler_params=pltpu.CompilerParams(
                dimension_semantics=("parallel", "parallel"),
                vmem_limit_bytes=_VMEM_LIMIT_BYTES,
            ),
            # TODO(synk): inference-only callers could pass
            # input_output_aliases={0: 0} to reuse x's HBM buffer.
        )(x3, scale, shift)
        return out3.reshape(N, C, H, W)

    # HW not 128-divisible (7x7 / 14x14 / 28x28 stages): normalize on the
    # flattened (N, C*HW) view with per-element scale/shift rows so output
    # stores are unmasked full-lane vst instead of masked ~HW-wide vst.msk.
    CW = C * HW
    w_tile = _pick_w_tile(N, CW, itemsize)
    if w_tile is not None:
        x2 = x_nchw.reshape(N, CW)
        scale_row = jnp.repeat(scale[:, 0], HW).reshape(1, CW)     # tiny, O(C*HW)
        shift_row = jnp.repeat(shift[:, 0], HW).reshape(1, CW)
        out2 = pl.pallas_call(
            _norm_flat_kernel,
            grid=(CW // w_tile,),
            in_specs=[
                pl.BlockSpec((N, w_tile), lambda t: (0, t)),
                pl.BlockSpec((1, w_tile), lambda t: (0, t)),
                pl.BlockSpec((1, w_tile), lambda t: (0, t)),
            ],
            out_specs=pl.BlockSpec((N, w_tile), lambda t: (0, t)),
            out_shape=jax.ShapeDtypeStruct((N, CW), x_nchw.dtype),
            compiler_params=pltpu.CompilerParams(
                dimension_semantics=("parallel",),
                vmem_limit_bytes=_VMEM_LIMIT_BYTES,
            ),
        )(x2, scale_row, shift_row)
        return out2.reshape(N, C, H, W)

    # Last-resort fallback: full-row (1, C, HW) blocks (masked stores).
    out3 = pl.pallas_call(
        _norm_nchw_kernel,
        grid=(N, 1),
        in_specs=[
            pl.BlockSpec((1, C, HW), lambda n, t: (n, 0, 0)),
            pl.BlockSpec((C, 1), lambda n, t: (0, 0)),
            pl.BlockSpec((C, 1), lambda n, t: (0, 0)),
        ],
        out_specs=pl.BlockSpec((1, C, HW), lambda n, t: (n, 0, 0)),
        out_shape=jax.ShapeDtypeStruct((N, C, HW), x_nchw.dtype),
        compiler_params=pltpu.CompilerParams(
            dimension_semantics=("parallel", "parallel"),
            vmem_limit_bytes=_VMEM_LIMIT_BYTES,
        ),
    )(x3, scale, shift)
    return out3.reshape(N, C, H, W)


# ---------------------------------------------------------------------------
# Reference + tests.
# ---------------------------------------------------------------------------
def _reference(x_nchw, gammas, betas, cls_ind=0):
    g = gammas[cls_ind].reshape(1, -1, 1, 1)
    b = betas[cls_ind].reshape(1, -1, 1, 1)
    mean = jnp.mean(x_nchw, axis=(0, 2, 3), keepdims=True)
    var = jnp.var(x_nchw, axis=(0, 2, 3), keepdims=True)
    return (x_nchw - mean) * jax.lax.rsqrt(var + EPS) * g + b


def _check(x, gammas, betas, cls_ind, tol):
    out = jax.block_until_ready(bn_mux_forward(x, gammas, betas, cls_ind=cls_ind))
    ref = _reference(x, gammas, betas, cls_ind=cls_ind)
    assert out.shape == x.shape and out.dtype == x.dtype
    err = float(jnp.max(jnp.abs(out - ref)))
    assert err < tol, f"max abs err {err} >= {tol} for shape {x.shape}"


if __name__ == "__main__":
    key = jax.random.PRNGKey(0)
    num_domains = 2                      # len(cfg.num_classes)
    cls_ind = 0                          # cfg.cls_ind

    # Small shape consistent with the module (planes=4): fused VMEM fast path.
    N, C, H, W = 2, 4, 16, 16
    kx, kg, kb = jax.random.split(key, 3)
    x = jax.random.normal(kx, (N, C, H, W), dtype=jnp.float32)
    # PyTorch BN default init is weight=1, bias=0; perturb so the affine part
    # is actually exercised.
    gammas = 1.0 + 0.1 * jax.random.normal(kg, (num_domains, C), dtype=jnp.float32)
    betas = 0.1 * jax.random.normal(kb, (num_domains, C), dtype=jnp.float32)
    _check(x, gammas, betas, cls_ind, tol=1e-4)

    # Larger shapes exercising the tiled two-pass paths.
    for shape in [(2, 64, 128, 128),     # HW % 128 == 0  -> (1, C, hw_tile) tiles
                  (16, 256, 28, 28)]:    # HW % 128 != 0  -> flattened lane-dense pass 2
        c2 = shape[1]
        kx2, kg2, kb2 = jax.random.split(jax.random.PRNGKey(1), 3)
        x2 = jax.random.normal(kx2, shape, dtype=jnp.float32)
        g2 = 1.0 + 0.1 * jax.random.normal(kg2, (num_domains, c2), dtype=jnp.float32)
        b2 = 0.1 * jax.random.normal(kb2, (num_domains, c2), dtype=jnp.float32)
        _check(x2, g2, b2, 1, tol=1e-3)

    print("KERNEL_OK")
</pallas_src>

<mosaic_0001>
module attributes {stable_mosaic.version = 11 : i64} {
  func.func @_fused_bn_kernel(%arg0: memref<2x4x256xf32, #tpu.memory_space<vmem>>, %arg1: memref<4x1xf32, #tpu.memory_space<vmem>>, %arg2: memref<4x1xf32, #tpu.memory_space<vmem>>, %arg3: memref<2x4x256xf32, #tpu.memory_space<vmem>>) attributes {dimension_semantics = [], scalar_prefetch = 0 : i64, scratch_operands = 0 : i64, tpu.core_type = #tpu.core_type<tc>} {
    %c0 = arith.constant 0 : index
    %c0_0 = arith.constant 0 : index
    %c0_1 = arith.constant 0 : index
    %0 = vector.load %arg0[%c0, %c0_0, %c0_1] : memref<2x4x256xf32, #tpu.memory_space<vmem>>, vector<2x4x256xf32>
    %cst = arith.constant dense<0.000000e+00> : vector<4xf32>
    %1 = vector.multi_reduction <add>, %0, %cst [0, 2] : vector<2x4x256xf32> to vector<4xf32>
    %2 = vector.shape_cast %1 : vector<4xf32> to vector<1x4x1xf32>
    %cst_2 = arith.constant 0.001953125 : f32
    %3 = vector.broadcast %cst_2 : f32 to vector<1x4x1xf32>
    %4 = arith.mulf %2, %3 : vector<1x4x1xf32>
    %5 = vector.broadcast %4 : vector<1x4x1xf32> to vector<2x4x256xf32>
    %6 = arith.subf %0, %5 : vector<2x4x256xf32>
    %7 = arith.mulf %6, %6 : vector<2x4x256xf32>
    %cst_3 = arith.constant dense<0.000000e+00> : vector<4xf32>
    %8 = vector.multi_reduction <add>, %7, %cst_3 [0, 2] : vector<2x4x256xf32> to vector<4xf32>
    %9 = vector.shape_cast %8 : vector<4xf32> to vector<1x4x1xf32>
    %cst_4 = arith.constant 0.001953125 : f32
    %10 = vector.broadcast %cst_4 : f32 to vector<1x4x1xf32>
    %11 = arith.mulf %9, %10 : vector<1x4x1xf32>
    %cst_5 = arith.constant 9.99999974E-6 : f32
    %12 = vector.broadcast %cst_5 : f32 to vector<1x4x1xf32>
    %13 = arith.addf %11, %12 : vector<1x4x1xf32>
    %14 = math.rsqrt %13 : vector<1x4x1xf32>
    %c0_6 = arith.constant 0 : index
    %c0_7 = arith.constant 0 : index
    %15 = vector.load %arg1[%c0_6, %c0_7] : memref<4x1xf32, #tpu.memory_space<vmem>>, vector<4x1xf32>
    %16 = vector.shape_cast %15 : vector<4x1xf32> to vector<1x4x1xf32>
    %c0_8 = arith.constant 0 : index
    %c0_9 = arith.constant 0 : index
    %17 = vector.load %arg2[%c0_8, %c0_9] : memref<4x1xf32, #tpu.memory_space<vmem>>, vector<4x1xf32>
    %18 = vector.shape_cast %17 : vector<4x1xf32> to vector<1x4x1xf32>
    %19 = arith.mulf %14, %16 : vector<1x4x1xf32>
    %20 = vector.broadcast %19 : vector<1x4x1xf32> to vector<2x4x256xf32>
    %21 = arith.mulf %6, %20 : vector<2x4x256xf32>
    %22 = vector.broadcast %18 : vector<1x4x1xf32> to vector<2x4x256xf32>
    %23 = arith.addf %21, %22 : vector<2x4x256xf32>
    %c0_10 = arith.constant 0 : index
    %c0_11 = arith.constant 0 : index
    %c0_12 = arith.constant 0 : index
    %24 = vector.load %arg3[%c0_10, %c0_11, %c0_12] : memref<2x4x256xf32, #tpu.memory_space<vmem>>, vector<2x4x256xf32>
    tpu.vector_store %arg3[%c0_10, %c0_11, %c0_12], %23 {strides = array<i32>} : memref<2x4x256xf32, #tpu.memory_space<vmem>>, vector<2x4x256xf32>,
    return
  }
}

</mosaic_0001>

<bundles_post_ra>
// kernel: bn_mux_forward.1
= control target key start
LH: loop header
LB: loop body
LE: loop exit
PB: predicated region body
PF: predicated region fallthrough
CT: control target
= control target key end

     0   :  { %vm22_vm0 = vcmask 1043456   ;;  %v109_v11 = vmov 839922192   ;;  %v37_v13 = vlaneseq  ;;  %v110_v33 = vmov 0   ;;  %s157_s0 = inlined_call_operand.vmem [shape: f32[2,4,256], index: 0, kind: input, shape index: {}]   ;;  %s158_s1 = inlined_call_operand.vmem [shape: f32[4,1], index: 1, kind: input, shape index: {}]   ;;  %s159_s2 = inlined_call_operand.vmem [shape: f32[4,1], index: 2, kind: input, shape index: {}]   ;;  %s160_s3 = inlined_call_operand.vmem [shape: f32[2,4,256], index: 3, kind: output, shape index: {}]  }
   0x1   :  { %v14_v0 = vld [vmem:[%s157_s0] sm:$0xff]  ;;  %v15_v1 = vld [vmem:[%s157_s0 + $0x8] sm:$0xff]  ;;  %v35_v12 = vunpack.c.l.s4 %v109_v11  ;;  %103 = vset.pattern.permute.xlu1 %v110_v33  ;;  %104 = vset.pattern.permute.xlu0 %v110_v33 }
   0x2   :  { %v18_v2 = vcombine.high %v14_v0, %v14_v0  ;;  %v19_v3 = vcombine.high %v15_v1, %v15_v1  ;;  %v23_v4 = vsel %vm22_vm0, %v14_v0, 0.0  ;;  %v26_v6 = vsel %vm22_vm0, %v15_v1, 0.0  ;;  %v64_v37 = vld [vmem:[%s158_s1] sm:$0xf] }
   0x3   :  { %v36_v14 = vunpack.c.0.s8 %v35_v12  ;;  %v38_v15 = vshrl.u32 %v37_v13, 7  ;;  %v65_v40 = vld [vmem:[%s159_s2] sm:$0xf] }
   0x4   :  { %v24_v5 = vsel %vm22_vm0, %v18_v2, 0.0  ;;  %v28_v8 = vsel %vm22_vm0, %v19_v3, 0.0 }
   0x5   :  { %v25_v7 = vadd.f32 %v24_v5, %v23_v4  ;;  %v39_v16 = vsub.s32 %v36_v14, %v38_v15 }
   0x7   :  { %v27_v9 = vadd.f32 %v26_v6, %v25_v7 }
   0x9   :  { %v29_v10 = vadd.f32 %v28_v8, %v27_v9 }
   0xb   :  { %30 = vadd.xlane.f32.xlu0 %v29_v10 }
  0x98   :  { %v31_v17 = vpop.xlane.xlu0 %30 }
  0x99   :  { %v32_v18 = vmul.f32 0.001953125, %v31_v17 }
  0x9b   :  { %v40_v19 = vrot.slane %v32_v18, %v39_v16 }
  0x9d   :  { %v42_v20 = vsub.f32 %v14_v0, %v40_v19  ;;  %v43_v21 = vsub.f32 %v15_v1, %v40_v19 }
  0x9f   :  { %v44_v22 = vmul.f32 %v42_v20, %v42_v20  ;;  %v45_v23 = vmul.f32 %v43_v21, %v43_v21 }
  0xa1   :  { %v48_v24 = vcombine.high %v44_v22, %v44_v22  ;;  %v49_v25 = vcombine.high %v45_v23, %v45_v23  ;;  %v52_v26 = vsel %vm22_vm0, %v44_v22, 0.0  ;;  %v55_v29 = vsel %vm22_vm0, %v45_v23, 0.0 }
  0xa3   :  { %v53_v27 = vsel %vm22_vm0, %v48_v24, 0.0  ;;  %v57_v31 = vsel %vm22_vm0, %v49_v25, 0.0 }
  0xa4   :  { %v54_v28 = vadd.f32 %v53_v27, %v52_v26 }
  0xa6   :  { %v56_v30 = vadd.f32 %v55_v29, %v54_v28 }
  0xa8   :  { %v58_v32 = vadd.f32 %v57_v31, %v56_v30 }
  0xaa   :  { %59 = vadd.xlane.f32.xlu0 %v58_v32 }
 0x137   :  { %v60_v34 = vpop.xlane.xlu0 %59 }
 0x138   :  { %v61_v35 = vmul.f32 0.001953125, %v60_v34 }
 0x13a   :  { %v62_v36 = vadd.f32 1e-05, %v61_v35 }
 0x13c   :  { %107 = vrsqrt.f32 %v62_v36 }
 0x146   :  { %v108_v38 = vpop.eup %107 }
 0x147   :  { %v66_v39 = vmul.f32 %v108_v38, %v64_v37 }
 0x149   :  { %69 = vperm.xlu1 %103, %v66_v39  }
 0x14d   :  { %83 = vperm.xlu1 %103, %v65_v40  }
 0x1c8   :  { %v70_v41 = vpop.permute.xlu1 %69 }
 0x1c9   :  { %v77_v42 = vrot.slane %v70_v41, %v39_v16 }
 0x1cb   :  { %v79_v44 = vmul.f32 %v77_v42, %v42_v20  ;;  %v80_v45 = vmul.f32 %v77_v42, %v43_v21 }
 0x1cc   :  { %v84_v43 = vpop.permute.xlu1 %83 }
 0x1cd   :  { %v91_v46 = vrot.slane %v84_v43, %v39_v16 }
 0x1cf   :  { %v93_v47 = vadd.f32 %v91_v46, %v79_v44  ;;  %v94_v48 = vadd.f32 %v91_v46, %v80_v45 }
 0x1d1   :  { %95 = vst [vmem:[%s160_s3] sm:$0xff] %v93_v47  ;;  %96 = vst [vmem:[%s160_s3 + $0x8] sm:$0xff] %v94_v48 }

</bundles_post_ra>
